<compile_context>
chip_gen: v6e
topology: v6e:2x2x1
jax: 0.10.0
libtpu: 0.0.40
codegen_flags: <defaults>
</compile_context>

<pallas_src>
import jax
import jax.numpy as jnp
from jax.experimental import pallas as pl
from jax.experimental.pallas import tpu as pltpu

CIN, COUT, KH, KW = 3, 64, 3, 3


def _conv_matmul_kernel(a_ref, w_ref, b_ref, o_ref):
    # a_ref: (1, K, P) bf16 im2col patches of one batch element (lane dim = P)
    # w_ref: (COUT, K)  bf16 flattened conv weight (VMEM-resident across steps)
    # b_ref: (COUT, 1)  f32 bias
    # o_ref: (1, COUT, P) f32 output tile (lane dim = P)
    acc = jnp.dot(w_ref[...], a_ref[0], preferred_element_type=jnp.float32)  # (COUT, P)
    o_ref[0] = (acc + b_ref[...]).astype(o_ref.dtype)                        # f32 epilogue


def simple_nn_forward(x, weight, bias):
    """x: (N, CIN, H, W) f32; weight: (COUT, CIN, KH, KW) f32; bias: (COUT,) f32."""
    N, C, H, W = x.shape
    assert C == CIN
    HO, WO = H - KH + 1, W - KW + 1
    P = HO * WO
    K = CIN * KH * KW

    # im2col glue (plain JAX, fuses under jit).  Feature order along K is
    # (cin, kh, kw) — matches weight.reshape(COUT, -1).  No transposes needed:
    # stack at axis=2 then reshape is already (N, K, P) with P = (ho, wo).
    cols = jnp.stack(
        [x[:, :, kh:kh + HO, kw:kw + WO] for kh in range(KH) for kw in range(KW)],
        axis=2,
    ).reshape(N, K, P).astype(jnp.bfloat16)          # (N, K, P)

    w2d = weight.reshape(COUT, K).astype(jnp.bfloat16)   # (COUT, K)
    b2d = bias.reshape(COUT, 1).astype(jnp.float32)      # (COUT, 1)

    out = pl.pallas_call(
        _conv_matmul_kernel,
        out_shape=jax.ShapeDtypeStruct((N, COUT, P), jnp.float32),
        grid_spec=pltpu.PrefetchScalarGridSpec(
            num_scalar_prefetch=0,
            grid=(N,),                                    # one grid step per batch element
            in_specs=[
                pl.BlockSpec((1, K, P), lambda n: (n, 0, 0)),
                pl.BlockSpec((COUT, K), lambda n: (0, 0)),   # constant index -> stays resident
                pl.BlockSpec((COUT, 1), lambda n: (0, 0)),
            ],
            out_specs=pl.BlockSpec((1, COUT, P), lambda n: (n, 0, 0)),
        ),
        compiler_params=pltpu.CompilerParams(
            dimension_semantics=("parallel",)),           # megacore sharding on v7x
    )(cols, w2d, b2d)

    # (N, COUT, P) is already (n, cout, ho*wo) -> pure reshape to NCHW, no transpose.
    return out.reshape(N, COUT, HO, WO)


if __name__ == "__main__":
    key = jax.random.PRNGKey(0)
    kx, kw_key, kb_key = jax.random.split(key, 3)

    N, H, W = 2, 16, 16
    x = jax.random.normal(kx, (N, CIN, H, W), dtype=jnp.float32)

    # Deterministic synthetic parameter init (PyTorch-style uniform bounds).
    fan_in = CIN * KH * KW
    bound = 1.0 / (fan_in ** 0.5)
    weight = jax.random.uniform(kw_key, (COUT, CIN, KH, KW), jnp.float32, -bound, bound)
    bias = jax.random.uniform(kb_key, (COUT,), jnp.float32, -bound, bound)

    fwd = jax.jit(simple_nn_forward)
    y = fwd(x, weight, bias)
    y = jax.block_until_ready(y)

    # Reference check against XLA's conv (same semantics as torch Conv2d, VALID padding).
    ref = jax.lax.conv_general_dilated(
        x, weight, window_strides=(1, 1), padding="VALID",
        dimension_numbers=("NCHW", "OIHW", "NCHW"),
    ) + bias[None, :, None, None]

    assert y.shape == (N, COUT, H - 2, W - 2)
    # bf16 matmul operands (f32 accumulation) -> loosened tolerance vs pure-f32 ref.
    assert jnp.allclose(y, ref, atol=1e-2, rtol=1e-2)
    print("KERNEL_OK")
</pallas_src>

<mosaic_0001>
module attributes {stable_mosaic.version = 11 : i64} {
  func.func @_conv_matmul_kernel(%arg0: i32, %arg1: memref<1x27x196xbf16, #tpu.memory_space<vmem>>, %arg2: memref<64x27xbf16, #tpu.memory_space<vmem>>, %arg3: memref<64x1xf32, #tpu.memory_space<vmem>>, %arg4: memref<1x64x196xf32, #tpu.memory_space<vmem>>) attributes {dimension_semantics = [#tpu.dimension_semantics<parallel>], iteration_bounds = array<i64: 2>, scalar_prefetch = 0 : i64, scratch_operands = 0 : i64, tpu.core_type = #tpu.core_type<tc>, window_params = [{transform_indices = @transform_0, window_bounds = array<i64: 1, 27, 196>}, {pipeline_mode = #tpu.pipeline_mode<synchronous>, transform_indices = @transform_1, window_bounds = array<i64: 64, 27>}, {pipeline_mode = #tpu.pipeline_mode<synchronous>, transform_indices = @transform_2, window_bounds = array<i64: 64, 1>}, {transform_indices = @transform_3, window_bounds = array<i64: 1, 64, 196>}]} {
    %c0 = arith.constant 0 : index
    %c0_0 = arith.constant 0 : index
    %0 = vector.load %arg2[%c0, %c0_0] : memref<64x27xbf16, #tpu.memory_space<vmem>>, vector<64x27xbf16>
    %c0_1 = arith.constant 0 : index
    %c0_2 = arith.constant 0 : index
    %c0_3 = arith.constant 0 : index
    %1 = vector.load %arg1[%c0_1, %c0_2, %c0_3] : memref<1x27x196xbf16, #tpu.memory_space<vmem>>, vector<1x27x196xbf16>
    %2 = vector.shape_cast %1 : vector<1x27x196xbf16> to vector<27x196xbf16>
    %cst = arith.constant dense<0.000000e+00> : vector<64x196xf32>
    %3 = tpu.matmul %0, %2, %cst {dimension_numbers = #tpu.dot_dimension_numbers<[1], [0], [0], [1], [0, 0, 1, 1], [], []>} : vector<64x27xbf16>, vector<27x196xbf16>, vector<64x196xf32> -> vector<64x196xf32>
    %c0_4 = arith.constant 0 : index
    %c0_5 = arith.constant 0 : index
    %4 = vector.load %arg3[%c0_4, %c0_5] : memref<64x1xf32, #tpu.memory_space<vmem>>, vector<64x1xf32>
    %5 = vector.broadcast %4 : vector<64x1xf32> to vector<64x196xf32>
    %6 = arith.addf %3, %5 : vector<64x196xf32>
    %c0_6 = arith.constant 0 : index
    %c0_7 = arith.constant 0 : index
    %c0_8 = arith.constant 0 : index
    %7 = vector.load %arg4[%c0_6, %c0_7, %c0_8] : memref<1x64x196xf32, #tpu.memory_space<vmem>>, vector<1x64x196xf32>
    %8 = vector.shape_cast %7 : vector<1x64x196xf32> to vector<64x196xf32>
    %9 = vector.shape_cast %6 : vector<64x196xf32> to vector<1x64x196xf32>
    tpu.vector_store %arg4[%c0_6, %c0_7, %c0_8], %9 {strides = array<i32>} : memref<1x64x196xf32, #tpu.memory_space<vmem>>, vector<1x64x196xf32>,
    return
  }
  func.func @transform_0(%arg0: i32) -> (i32, i32, i32) {
    %c0_i32 = arith.constant 0 : i32
    %c0_i32_0 = arith.constant 0 : i32
    %c0_i32_1 = arith.constant 0 : i32
    return %arg0, %c0_i32, %c0_i32_0 : i32, i32, i32
  }
  func.func @transform_1(%arg0: i32) -> (i32, i32) {
    %c0_i32 = arith.constant 0 : i32
    %c0_i32_0 = arith.constant 0 : i32
    %c0_i32_1 = arith.constant 0 : i32
    return %c0_i32, %c0_i32_0 : i32, i32
  }
  func.func @transform_2(%arg0: i32) -> (i32, i32) {
    %c0_i32 = arith.constant 0 : i32
    %c0_i32_0 = arith.constant 0 : i32
    %c0_i32_1 = arith.constant 0 : i32
    return %c0_i32, %c0_i32_0 : i32, i32
  }
  func.func @transform_3(%arg0: i32) -> (i32, i32, i32) {
    %c0_i32 = arith.constant 0 : i32
    %c0_i32_0 = arith.constant 0 : i32
    %c0_i32_1 = arith.constant 0 : i32
    return %arg0, %c0_i32, %c0_i32_0 : i32, i32, i32
  }
}

</mosaic_0001>

<bundles_post_ra>
// kernel: simple_nn_forward.1
= control target key start
LH: loop header
LB: loop body
LE: loop exit
PB: predicated region body
PF: predicated region fallthrough
CT: control target
= control target key end

     0   :  { %s519_s12 = smov 0   ;;  %s602_s0 = inlined_call_operand.vmem [shape: bf16[2,27,196], index: 0, kind: input, shape index: {}]   ;;  %s603_s1 = inlined_call_operand.vmem [shape: bf16[64,27], index: 1, kind: input, shape index: {}]   ;;  %s604_s2 = inlined_call_operand.vmem [shape: f32[64,1], index: 2, kind: input, shape index: {}]   ;;  %s605_s3 = inlined_call_operand.vmem [shape: f32[2,64,196], index: 3, kind: output, shape index: {}]  }
   0x1 LB: > { %s438_s13 = sadd.s32 4294967295, %s495_s12   ;;  %p442_p0 = scmp.ge.s32.totalorder %s495_s12, 1  ;;  %s495_s12 = sphi %s519_s12, %s13_s12  }
   0x2   : > { %p137_p1 = scmp.lt.s32.totalorder %s495_s12, 3 }
   0x4   : > { %p138_p2 = pnand %p442_p0, %p137_p1 }
   0x5   : > { %p161_p3 = scmp.lt.s32.totalorder (!%p138_p2), %s438_s13, 1 }
   0x6   : > { %141 = sbr.rel (%p138_p2) target bundleno = 235 (0xeb), region = 32 }
   0xb   : > { %vm283_vm0 = vcmask 1044480   ;;  %vm284_vm1 = vcmask 1045504   ;;  %v497_v0 = vmov 0   ;;  %s607_s13 = smov (!%p161_p3, %s438_s13), 1  ;;  %v498_v1 = vmov 65535   ;;  %v186_v4 = vld [vmem:[%s604_s2 + $0x10] sm:$0xff] }
   0xc   : > { %325 = vmatprep.mubr.bf16.mxu0 %v497_v0  ;;  %345 = vmatprep.mubr.bf16.mxu1 %v497_v0  ;;  %v285_v2 = vsel %vm283_vm0, 4294967295, %v498_v1  ;;  %s461_s14 = sshll.u32 %s607_s13, 5  ;;  %v184_v5 = vld [vmem:[%s604_s2] sm:$0xff]  ;;  %v187_v11 = vld [vmem:[%s604_s2 + $0x18] sm:$0xff]  ;;  %v185_v12 = vld [vmem:[%s604_s2 + $0x8] sm:$0xff]  ;;  %vm270_vm2 = vcmask 220160  }
   0xd   : > { %478 = vset.pattern.permute.xlu1 %v497_v0  ;;  %477 = vset.pattern.permute.xlu0 %v497_v0  ;;  %s165_s17 = scalar_lea.vmem %s602_s0, %s461_s14  ;;  %v286_v3 = vsel %vm284_vm1, %v285_v2, 0  ;;  %v485_v14 = vld [vmem:[%s603_s1] sm:$0xff]   ;;  %v486_v15 = vld [vmem:[%s603_s1 + $0x10] sm:$0xff]   ;;  %v189_v16 = vld [vmem:[%s604_s2 + $0x28] sm:$0xff]  ;;  %vm367_vm3 = vcmask 556032  }
   0xe   : > { %v479_v6 = vld [vmem:[%s165_s17 + $0x14] ss:$8 sps:$4 sm:$0x3f]   ;;  %204 = vperm.xlu1 %478, %v186_v4   ;;  %194 = vperm.xlu0 %477, %v184_v5   ;;  %v481_v7 = vld [vmem:[%s165_s17 + $0x10] ss:$8 sps:$4 sm:$0x3f]  }
   0xf   : > { %v291_v8 = vand.u32 %v479_v6, %v286_v3  ;;  %v482_v9 = vld [vmem:[%s165_s17 + $0x4] ss:$8 sps:$4 sm:$0xff]   ;;  %v288_v10 = vand.u32 %v481_v7, %v286_v3  ;;  %v484_v13 = vld [vmem:[%s165_s17] ss:$8 sps:$4 sm:$0xff]   ;;  %v191_v18 = vld [vmem:[%s604_s2 + $0x38] sm:$0xff]  ;;  %s462_s17 = sshll.u32 %s607_s13, 7 }
  0x10   : > { %v188_v17 = vld [vmem:[%s604_s2 + $0x20] sm:$0xff]  ;;  %v190_v19 = vld [vmem:[%s604_s2 + $0x30] sm:$0xff]  ;;  %v487_v20 = vld [vmem:[%s603_s1 + $0x8] sm:$0xff]   ;;  %s573_s20 = scalar_lea.vmem %s605_s3, %s462_s17 }
  0x11   : > { %305 = vmatprep.subr.bf16.mxu0 %v291_v8  ;;  %463 = vmatprep.subr.bf16.mxu1 %v291_v8  ;;  %v488_v21 = vld [vmem:[%s603_s1 + $0x18] sm:$0xff]  }
  0x12   : > { %306 = vmatpush1.bf16.msra.mxu0 %v288_v10  ;;  %465 = vmatpush1.bf16.msra.mxu1 %v288_v10 }
  0x13   : > { %307 = vmatprep.subr.bf16.mxu0 %v482_v9  ;;  %464 = vmatprep.subr.bf16.mxu1 %v482_v9 }
  0x14   : > { %209 = vperm.xlu1 %478, %v187_v11   ;;  %199 = vperm.xlu0 %477, %v185_v12  }
  0x16   : > { %308 = vmatpush1.bf16.msra.mxu0 %v484_v13  ;;  %466 = vmatpush1.bf16.msra.mxu1 %v484_v13 }
  0x18   : > { %219 = vperm.xlu1 %478, %v189_v16   ;;  %214 = vperm.xlu0 %477, %v188_v17  }
  0x19   : > { %455 = vmatmul.mubr.msk.bf16.vlgmr.msra.gmra.mxu0 %vm270_vm2, %v485_v14  ;;  %457 = vmatmul.mubr.msk.bf16.vlgmr.msra.gmra.mxu1 %vm270_vm2, %v486_v15 }
  0x1a   : > { %335 = vmatprep.mubr.bf16.mxu0 %v497_v0  ;;  %355 = vmatprep.mubr.bf16.mxu1 %v497_v0 }
  0x1c   : > { %229 = vperm.xlu1 %478, %v191_v18   ;;  %224 = vperm.xlu0 %477, %v190_v19  }
  0x21   : > { %456 = vmatmul.mubr.msk.bf16.gmra.mxu0 %vm270_vm2, %v487_v20  ;;  %458 = vmatmul.mubr.msk.bf16.gmra.mxu1 %vm270_vm2, %v488_v21 }
  0x89   : > { %v195_v22 = vpop.permute.xlu0 %194  ;;  %v205_v23 = vpop.permute.xlu1 %204 }
  0x8f   : > { %v200_v24 = vpop.permute.xlu0 %199  ;;  %v210_v25 = vpop.permute.xlu1 %209 }
  0x93   : > { %v215_v26 = vpop.permute.xlu0 %214  ;;  %v220_v33 = vpop.permute.xlu1 %219 }
  0x97   : > { %v225_v42 = vpop.permute.xlu0 %224  ;;  %v230_v51 = vpop.permute.xlu1 %229 }
  0xd9   : > { %v327_v27 = vpop.f32.mrf.mxu0  ;;  %v347_v28 = vpop.f32.mrf.mxu1 }
  0xda   : > { %v328_v29 = vadd.f32 %v327_v27, %v195_v22  ;;  %v348_v30 = vadd.f32 %v347_v28, %v215_v26 }
  0xdb   : > { %v329_v31 = vpop.f32.mrf.mxu0  ;;  %v349_v32 = vpop.f32.mrf.mxu1 }
  0xdc   : > { %366 = vst [vmem:[%s573_s20] sm:$0xff] %v328_v29  ;;  %375 = vst [vmem:[%s573_s20 + $0x40] sm:$0xff] %v348_v30  ;;  %v330_v34 = vadd.f32 %v329_v31, %v195_v22  ;;  %v350_v35 = vadd.f32 %v349_v32, %v215_v26 }
  0xdd   : > { %v331_v36 = vpop.f32.mrf.mxu0  ;;  %v351_v37 = vpop.f32.mrf.mxu1 }
  0xde   : > { %368 = vst.msk [vmem:[%s573_s20 + $0x8] sm:$0xff] %vm367_vm3, %v330_v34  ;;  %376 = vst.msk [vmem:[%s573_s20 + $0x48] sm:$0xff] %vm367_vm3, %v350_v35  ;;  %v332_v38 = vadd.f32 %v331_v36, %v200_v24  ;;  %v352_v39 = vadd.f32 %v351_v37, %v220_v33 }
  0xdf   : > { %v333_v40 = vpop.f32.mrf.mxu0  ;;  %v353_v41 = vpop.f32.mrf.mxu1 }
  0xe0   : > { %369 = vst [vmem:[%s573_s20 + $0x10] sm:$0xff] %v332_v38  ;;  %377 = vst [vmem:[%s573_s20 + $0x50] sm:$0xff] %v352_v39  ;;  %v334_v43 = vadd.f32 %v333_v40, %v200_v24  ;;  %v354_v44 = vadd.f32 %v353_v41, %v220_v33 }
  0xe1   : > { %v337_v45 = vpop.f32.mrf.mxu0  ;;  %v357_v46 = vpop.f32.mrf.mxu1 }
  0xe2   : > { %370 = vst.msk [vmem:[%s573_s20 + $0x18] sm:$0xff] %vm367_vm3, %v334_v43  ;;  %378 = vst.msk [vmem:[%s573_s20 + $0x58] sm:$0xff] %vm367_vm3, %v354_v44  ;;  %v338_v47 = vadd.f32 %v337_v45, %v205_v23  ;;  %v358_v48 = vadd.f32 %v357_v46, %v225_v42 }
  0xe3   : > { %v339_v49 = vpop.f32.mrf.mxu0  ;;  %v359_v50 = vpop.f32.mrf.mxu1 }
  0xe4   : > { %371 = vst [vmem:[%s573_s20 + $0x20] sm:$0xff] %v338_v47  ;;  %379 = vst [vmem:[%s573_s20 + $0x60] sm:$0xff] %v358_v48  ;;  %v340_v52 = vadd.f32 %v339_v49, %v205_v23  ;;  %v360_v53 = vadd.f32 %v359_v50, %v225_v42 }
  0xe5   : > { %v341_v54 = vpop.f32.mrf.mxu0  ;;  %v361_v55 = vpop.f32.mrf.mxu1 }
  0xe6   : > { %372 = vst.msk [vmem:[%s573_s20 + $0x28] sm:$0xff] %vm367_vm3, %v340_v52  ;;  %380 = vst.msk [vmem:[%s573_s20 + $0x68] sm:$0xff] %vm367_vm3, %v360_v53  ;;  %v342_v56 = vadd.f32 %v341_v54, %v210_v25  ;;  %v362_v57 = vadd.f32 %v361_v55, %v230_v51 }
  0xe7   : > { %v343_v58 = vpop.f32.mrf.mxu0  ;;  %v363_v59 = vpop.f32.mrf.mxu1 }
  0xe8   : > { %373 = vst [vmem:[%s573_s20 + $0x30] sm:$0xff] %v342_v56  ;;  %381 = vst [vmem:[%s573_s20 + $0x70] sm:$0xff] %v362_v57  ;;  %v344_v60 = vadd.f32 %v343_v58, %v210_v25  ;;  %v364_v61 = vadd.f32 %v363_v59, %v230_v51 }
  0xea   : > { %374 = vst.msk [vmem:[%s573_s20 + $0x38] sm:$0xff] %vm367_vm3, %v344_v60  ;;  %382 = vst.msk [vmem:[%s573_s20 + $0x78] sm:$0xff] %vm367_vm3, %v364_v61 }
  0xeb PF: > { %s13_s12 = sadd.s32 1, %s495_s12  }
  0xec   : > { %p10_p4 = scmp.ge.s32.totalorder %s13_s12, 4  }
  0xee   :  { %12 = sbr.rel (!%p10_p4) target bundleno = 1 (0x1), region = 62 }

</bundles_post_ra>
